<compile_context>
chip_gen: v7x
topology: tpu7x:2x2x1
jax: 0.10.0
libtpu: 0.0.40
codegen_flags: <defaults>
</compile_context>

<pallas_src>
import jax
import jax.numpy as jnp
import numpy as np
from jax import lax
from jax.experimental import pallas as pl
from jax.experimental.pallas import tpu as pltpu


def head_graph_kernel(x_ref, wqk_ref, wv_ref, bias_ref, adjw_ref, we0_ref, out_ref):
    """Single invocation: compute batch 0, zero-fill the remaining batch slots.

    x_ref    : (B, N, C) f32   full input (batch 0 selected in-kernel)
    wqk_ref  : (C, C)    bf16  (scale * Wq) @ Wk^T        (precomputed once)
    wv_ref   : (C, F)    bf16  value projection weight
    bias_ref : (N, N)    f32   additive mask: 0 where edge, -1e30 where none
    adjw_ref : (N, N)    f32   we1 * adj                   (precomputed once)
    we0_ref  : (1,)      f32   SMEM scalar: softmax weight of `weighting1`
    out_ref  : (B, N, F) f32   full batched output
    """
    xb = x_ref[0].astype(jnp.bfloat16)                                    # (N, C)

    # Scores: x @ W_qk @ x^T  (1/sqrt(F) already folded into W_qk).
    t = jnp.dot(xb, wqk_ref[...], preferred_element_type=jnp.float32)    # (N, C)
    wei = lax.dot_general(
        t.astype(jnp.bfloat16), xb,
        dimension_numbers=(((1,), (1,)), ((), ())),      # contract feature axis: t @ x^T
        preferred_element_type=jnp.float32)                               # (N, N)

    # Value projection.
    v = jnp.dot(xb, wv_ref[...], preferred_element_type=jnp.float32)     # (N, F)

    # Additive neighbour mask (single vadd instead of vcmp+vselect).
    # Rows with at least one neighbour (self-loops present) match -inf masking.
    wei = wei + bias_ref[...]

    # Row-wise softmax in f32; we0 folded into the approx-reciprocal (EUP) norm.
    wei = wei - jnp.max(wei, axis=-1, keepdims=True)
    wei = jnp.exp(wei)
    row_sum = jnp.sum(wei, axis=-1, keepdims=True)
    wei = wei * (we0_ref[0] * pl.reciprocal(row_sum, approx=True))

    # Blend with pre-scaled adjacency (we1 * adj precomputed in the wrapper).
    wei = wei + adjw_ref[...]
    # TODO(synk): nn.Dropout(0.1) omitted — identity in eval mode.

    result = jnp.dot(wei.astype(jnp.bfloat16), v.astype(jnp.bfloat16),
                     preferred_element_type=jnp.float32)                 # (N, F)

    # Batched output assembled entirely inside the kernel: zeros everywhere
    # (PyTorch forward `break`s after i == 0), then result into slot 0.
    out_ref[...] = jnp.zeros_like(out_ref)
    out_ref[0] = result


def prepare_head_graph_params(wq, wk, wv, adj, wpair):
    """One-time (parameter-load-time) preparation, hoisted out of the hot path.

    wq/wk/wv are stored transposed w.r.t. torch nn.Linear, i.e. shape (C, F),
    so that x @ W reproduces nn.Linear(h_size, f_out_size, bias=False)(x).
    """
    F = wq.shape[1]
    scale = F ** (-0.5)
    w_qk = ((wq * scale) @ wk.T).astype(jnp.bfloat16)                    # (C, C)
    wv_b = wv.astype(jnp.bfloat16)                                       # (C, F)
    bias = jnp.where(adj == 0.0, jnp.float32(-1e30), jnp.float32(0.0))   # (N, N)
    we = jax.nn.softmax(wpair)                                           # 2-elt softmax
    adj_w = (we[1] * adj).astype(jnp.float32)                            # (N, N)
    we0 = we[0].reshape(1).astype(jnp.float32)                           # SMEM scalar
    return w_qk, wv_b, bias, adj_w, we0


@jax.jit
def head_graph(x, w_qk, wv_b, bias, adj_w, we0):
    B, N, C = x.shape
    F = wv_b.shape[1]

    flops = (2 * N * C * C          # x @ W_qk
             + 2 * N * N * C        # (x W_qk) @ x^T
             + 2 * N * C * F        # x @ Wv
             + 2 * N * N * F        # P @ V
             + 8 * N * N)           # softmax / mask / blend epilogue
    bytes_accessed = (x.size * 4 + w_qk.size * 2 + wv_b.size * 2
                      + bias.size * 4 + adj_w.size * 4 + 4 + B * N * F * 4)

    return pl.pallas_call(
        head_graph_kernel,
        out_shape=jax.ShapeDtypeStruct((B, N, F), jnp.float32),
        in_specs=[
            pl.BlockSpec(memory_space=pltpu.MemorySpace.VMEM),   # x (full batch)
            pl.BlockSpec(memory_space=pltpu.MemorySpace.VMEM),   # W_qk
            pl.BlockSpec(memory_space=pltpu.MemorySpace.VMEM),   # Wv
            pl.BlockSpec(memory_space=pltpu.MemorySpace.VMEM),   # additive mask
            pl.BlockSpec(memory_space=pltpu.MemorySpace.VMEM),   # we1 * adj
            pl.BlockSpec(memory_space=pltpu.MemorySpace.SMEM),   # we0 scalar
        ],
        out_specs=pl.BlockSpec(memory_space=pltpu.MemorySpace.VMEM),
        cost_estimate=pl.CostEstimate(
            flops=flops, transcendentals=N * N + N, bytes_accessed=bytes_accessed),
    )(x, w_qk, wv_b, bias, adj_w, we0)


def head_graph_reference(x, wq, wk, wv, adj, wpair):
    """Plain-JAX f32 reference mirroring the PyTorch forward (eval mode)."""
    B, N, C = x.shape
    F = wq.shape[1]
    out = jnp.zeros((B, N, F), jnp.float32)
    xb = x[0]
    q, k, v = xb @ wq, xb @ wk, xb @ wv
    wei = (q @ k.T) * (F ** -0.5)
    wei = jnp.where(adj == 0.0, -jnp.inf, wei)
    wei = jax.nn.softmax(wei, axis=-1)
    we = jax.nn.softmax(wpair)
    wei = we[0] * wei + we[1] * adj
    return out.at[0].set(wei @ v)


if __name__ == "__main__":
    B, N, H, F = 2, 8, 32, 32   # batch, nodes, h_size, f_out_size

    key = jax.random.PRNGKey(0)
    kx, kq, kk, kv, ka, kw = jax.random.split(key, 6)

    x = jax.random.normal(kx, (B, N, H), jnp.float32)

    # Xavier-normal init (std = sqrt(2 / (fan_in + fan_out))), stored as (C, F).
    std = float(np.sqrt(2.0 / (H + F)))
    wq = std * jax.random.normal(kq, (H, F), jnp.float32)
    wk = std * jax.random.normal(kk, (H, F), jnp.float32)
    wv = std * jax.random.normal(kv, (H, F), jnp.float32)

    # Random 0/1 adjacency with self-loops (so no softmax row is fully masked).
    adj = (jax.random.uniform(ka, (N, N)) < 0.4).astype(jnp.float32)
    adj = jnp.maximum(adj, jnp.eye(N, dtype=jnp.float32))

    # weighting1, weighting2 parameters (torch.randn(1) each).
    wpair = jax.random.normal(kw, (2,), jnp.float32)

    # One-time parameter preparation (outside the hot path).
    params = prepare_head_graph_params(wq, wk, wv, adj, wpair)
    params = tuple(jax.block_until_ready(p) for p in params)

    out = head_graph(x, *params)
    out = jax.block_until_ready(out)

    ref = head_graph_reference(x, wq, wk, wv, adj, wpair)
    # Tolerance accounts for bf16 MXU operands (f32 accumulation), the W_qk
    # pre-contraction, and the approximate-reciprocal softmax normalization.
    np.testing.assert_allclose(np.asarray(out), np.asarray(ref), rtol=5e-2, atol=5e-2)

    print("KERNEL_OK")
</pallas_src>

<mosaic_0001>
module attributes {stable_mosaic.version = 11 : i64} {
  func.func @head_graph_kernel(%arg0: memref<2x8x32xf32, #tpu.memory_space<vmem>>, %arg1: memref<32x32xbf16, #tpu.memory_space<vmem>>, %arg2: memref<32x32xbf16, #tpu.memory_space<vmem>>, %arg3: memref<8x8xf32, #tpu.memory_space<vmem>>, %arg4: memref<8x8xf32, #tpu.memory_space<vmem>>, %arg5: memref<1xf32, #tpu.memory_space<smem>>, %arg6: memref<2x8x32xf32, #tpu.memory_space<vmem>>) attributes {dimension_semantics = [], scalar_prefetch = 0 : i64, scratch_operands = 0 : i64, tpu.core_type = #tpu.core_type<tc>} {
    %c0 = arith.constant 0 : index
    %c0_0 = arith.constant 0 : index
    %c0_1 = arith.constant 0 : index
    %0 = vector.load %arg0[%c0, %c0_0, %c0_1] : memref<2x8x32xf32, #tpu.memory_space<vmem>>, vector<1x8x32xf32>
    %1 = vector.shape_cast %0 : vector<1x8x32xf32> to vector<8x32xf32>
    %2 = arith.truncf %1 : vector<8x32xf32> to vector<8x32xbf16>
    %c0_2 = arith.constant 0 : index
    %c0_3 = arith.constant 0 : index
    %3 = vector.load %arg1[%c0_2, %c0_3] : memref<32x32xbf16, #tpu.memory_space<vmem>>, vector<32x32xbf16>
    %cst = arith.constant dense<0.000000e+00> : vector<8x32xf32>
    %4 = tpu.matmul %2, %3, %cst {dimension_numbers = #tpu.dot_dimension_numbers<[1], [0], [0], [1], [0, 0, 1, 1], [], []>} : vector<8x32xbf16>, vector<32x32xbf16>, vector<8x32xf32> -> vector<8x32xf32>
    %5 = arith.truncf %4 : vector<8x32xf32> to vector<8x32xbf16>
    %cst_4 = arith.constant dense<0.000000e+00> : vector<8x8xf32>
    %6 = tpu.matmul %5, %2, %cst_4 {dimension_numbers = #tpu.dot_dimension_numbers<[1], [1], [0], [0], [0, 0, 1, 0], [], []>} : vector<8x32xbf16>, vector<8x32xbf16>, vector<8x8xf32> -> vector<8x8xf32>
    %c0_5 = arith.constant 0 : index
    %c0_6 = arith.constant 0 : index
    %7 = vector.load %arg2[%c0_5, %c0_6] : memref<32x32xbf16, #tpu.memory_space<vmem>>, vector<32x32xbf16>
    %cst_7 = arith.constant dense<0.000000e+00> : vector<8x32xf32>
    %8 = tpu.matmul %2, %7, %cst_7 {dimension_numbers = #tpu.dot_dimension_numbers<[1], [0], [0], [1], [0, 0, 1, 1], [], []>} : vector<8x32xbf16>, vector<32x32xbf16>, vector<8x32xf32> -> vector<8x32xf32>
    %c0_8 = arith.constant 0 : index
    %c0_9 = arith.constant 0 : index
    %9 = vector.load %arg3[%c0_8, %c0_9] : memref<8x8xf32, #tpu.memory_space<vmem>>, vector<8x8xf32>
    %10 = arith.addf %6, %9 : vector<8x8xf32>
    %cst_10 = arith.constant dense<0xFF800000> : vector<8xf32>
    %11 = vector.multi_reduction <maximumf>, %10, %cst_10 [1] : vector<8x8xf32> to vector<8xf32>
    %12 = vector.shape_cast %11 : vector<8xf32> to vector<8x1xf32>
    %13 = vector.broadcast %12 : vector<8x1xf32> to vector<8x8xf32>
    %14 = arith.subf %10, %13 : vector<8x8xf32>
    %15 = math.exp %14 : vector<8x8xf32>
    %cst_11 = arith.constant dense<0.000000e+00> : vector<8xf32>
    %16 = vector.multi_reduction <add>, %15, %cst_11 [1] : vector<8x8xf32> to vector<8xf32>
    %17 = vector.shape_cast %16 : vector<8xf32> to vector<8x1xf32>
    %c0_12 = arith.constant 0 : index
    %18 = memref.load %arg5[%c0_12] : memref<1xf32, #tpu.memory_space<smem>>
    %19 = tpu.reciprocal %17 {approx = true} : vector<8x1xf32> -> vector<8x1xf32>
    %20 = vector.broadcast %18 : f32 to vector<8x1xf32>
    %21 = arith.mulf %20, %19 : vector<8x1xf32>
    %22 = vector.broadcast %21 : vector<8x1xf32> to vector<8x8xf32>
    %23 = arith.mulf %15, %22 : vector<8x8xf32>
    %c0_13 = arith.constant 0 : index
    %c0_14 = arith.constant 0 : index
    %24 = vector.load %arg4[%c0_13, %c0_14] : memref<8x8xf32, #tpu.memory_space<vmem>>, vector<8x8xf32>
    %25 = arith.addf %23, %24 : vector<8x8xf32>
    %26 = arith.truncf %25 : vector<8x8xf32> to vector<8x8xbf16>
    %27 = arith.truncf %8 : vector<8x32xf32> to vector<8x32xbf16>
    %cst_15 = arith.constant dense<0.000000e+00> : vector<8x32xf32>
    %28 = tpu.matmul %26, %27, %cst_15 {dimension_numbers = #tpu.dot_dimension_numbers<[1], [0], [0], [1], [0, 0, 1, 1], [], []>} : vector<8x8xbf16>, vector<8x32xbf16>, vector<8x32xf32> -> vector<8x32xf32>
    %cst_16 = arith.constant 0.000000e+00 : f32
    %29 = vector.broadcast %cst_16 : f32 to vector<2x8x32xf32>
    %c0_17 = arith.constant 0 : index
    %c0_18 = arith.constant 0 : index
    %c0_19 = arith.constant 0 : index
    %30 = vector.load %arg6[%c0_17, %c0_18, %c0_19] : memref<2x8x32xf32, #tpu.memory_space<vmem>>, vector<2x8x32xf32>
    tpu.vector_store %arg6[%c0_17, %c0_18, %c0_19], %29 {strides = array<i32>} : memref<2x8x32xf32, #tpu.memory_space<vmem>>, vector<2x8x32xf32>,
    %c0_20 = arith.constant 0 : index
    %c0_21 = arith.constant 0 : index
    %c0_22 = arith.constant 0 : index
    %31 = vector.load %arg6[%c0_20, %c0_21, %c0_22] : memref<2x8x32xf32, #tpu.memory_space<vmem>>, vector<1x8x32xf32>
    %32 = vector.shape_cast %31 : vector<1x8x32xf32> to vector<8x32xf32>
    %33 = vector.shape_cast %28 : vector<8x32xf32> to vector<1x8x32xf32>
    tpu.vector_store %arg6[%c0_20, %c0_21, %c0_22], %33 {strides = array<i32>} : memref<2x8x32xf32, #tpu.memory_space<vmem>>, vector<1x8x32xf32>,
    return
  }
}

</mosaic_0001>

<bundles_post_ra>
// kernel: head_graph.1
= control target key start
LH: loop header
LB: loop body
LE: loop exit
PB: predicated region body
PF: predicated region fallthrough
CT: control target
= control target key end

     0   :  { %12 = vsyncpa [#allocation4], 0  ;;  %s603_s0 = inlined_call_operand.hbm [shape: f32[2,8,32], index: 0, kind: input, shape index: {}]   ;;  %s604_s1 = inlined_call_operand.hbm [shape: bf16[32,32], index: 1, kind: input, shape index: {}]   ;;  %s605_s2 = inlined_call_operand.hbm [shape: bf16[32,32], index: 2, kind: input, shape index: {}]   ;;  %s606_s3 = inlined_call_operand.vmem [shape: f32[8,8], index: 3, kind: input, shape index: {}]   ;;  %s607_s4 = inlined_call_operand.vmem [shape: f32[8,8], index: 4, kind: input, shape index: {}]   ;;  %s608_s5 = inlined_call_operand.<no memory space> [shape: f32[1], index: 5, kind: input, shape index: {}]   ;;  %s609_s6 = inlined_call_operand.hbm [shape: f32[2,8,32], index: 6, kind: output, shape index: {}]  }
   0x1   :  { %13 = vsyncpa [#allocation7], 0 }
   0x2   :  { %14 = vsyncpa [#allocation5], 0  ;;  %s475_s21 = smov [#allocation6]   ;;  %s381_s25 = scalar_lea.hbm %s604_s1, 256 }
   0x3   :  { %s32_s22 = sshll.u32 %s475_s21, 4  ;;  %p382_p0 = scmp.ne.s32.totalorder %s604_s1, %s381_s25  ;;  %s33_s22 = int_to_ptr.vmem [resolvable:$true] %s32_s22 }
   0x4   :  { %p385_p1 = scmp.lt.u32.totalorder %s381_s25, %s604_s1 }
   0x6   :  { %p387_p2 = pnand %p385_p1, %p382_p0 }
   0x8   :  { %390 = shalt.err (!%p387_p2)
}
   0x9   :  { %s391_s30 = scalar_lea.vmem %s33_s22, 256  ;;  %p396_p4 = scmp.lt.s32.totalorder %s33_s22, %s33_s22 }
   0xa   :  { %p392_p3 = scmp.ne.s32.totalorder %s33_s22, %s391_s30  ;;  %p397_p5 = scmp.lt.s32.totalorder %s391_s30, %s391_s30 }
   0xc   :  { %p398_p6 = por %p397_p5, %p396_p4 }
   0xe   :  { %p399_p7 = pnand %p398_p6, %p392_p3 }
  0x10   :  { %402 = shalt.err (!%p399_p7)
}
  0x11   :  { %s476_s7 = smov 64   ;;  %s477_s8 = smov 4  }
  0x12   :  { %38 = dma.hbm_to_vmem [thread:$0]  %s604_s1, 256, %s33_s22, [#allocation7], %s476_s7, %s476_s7, %s477_s8  }
  0x13   :  { %s478_s11 = smov [#allocation3]   ;;  %s403_s15 = scalar_lea.hbm %s603_s0, 256 }
  0x14   :  { %s20_s12 = sshll.u32 %s478_s11, 4  ;;  %p404_p8 = scmp.ne.s32.totalorder %s603_s0, %s403_s15  ;;  %s21_s12 = int_to_ptr.vmem [resolvable:$true] %s20_s12 }
  0x15   :  { %p407_p9 = scmp.lt.u32.totalorder %s403_s15, %s603_s0 }
  0x17   :  { %p409_p10 = pnand %p407_p9, %p404_p8 }
  0x19   :  { %412 = shalt.err (!%p409_p10)
}
  0x1a   :  { %s413_s20 = scalar_lea.vmem %s21_s12, 256  ;;  %p418_p12 = scmp.lt.s32.totalorder %s21_s12, %s21_s12 }
  0x1b   :  { %p414_p11 = scmp.ne.s32.totalorder %s21_s12, %s413_s20  ;;  %p419_p13 = scmp.lt.s32.totalorder %s413_s20, %s413_s20 }
  0x1d   :  { %p420_p0 = por %p419_p13, %p418_p12 }
  0x1f   :  { %p421_p1 = pnand %p420_p0, %p414_p11 }
  0x21   :  { %424 = shalt.err (!%p421_p1)
}
  0x22   :  { %s479_s1 = smov 128   ;;  %s480_s21 = smov 8  }
  0x23   :  { %26 = dma.hbm_to_vmem [thread:$0]  %s603_s0, 256, %s21_s12, [#allocation4], %s479_s1, %s479_s1, %s480_s21  }
  0x24   :  { %s481_s24 = smov [#allocation8]   ;;  %s425_s28 = scalar_lea.hbm %s605_s2, 256 }
  0x25   :  { %s44_s25 = sshll.u32 %s481_s24, 4  ;;  %p426_p2 = scmp.ne.s32.totalorder %s605_s2, %s425_s28  ;;  %s45_s25 = int_to_ptr.vmem [resolvable:$true] %s44_s25 }
  0x26   :  { %p429_p3 = scmp.lt.u32.totalorder %s425_s28, %s605_s2 }
  0x28   :  { %p431_p4 = pnand %p429_p3, %p426_p2 }
  0x2a   :  { %434 = shalt.err (!%p431_p4)
}
  0x2b   :  { %s435_s11 = scalar_lea.vmem %s45_s25, 256  ;;  %p440_p6 = scmp.lt.s32.totalorder %s45_s25, %s45_s25 }
  0x2c   :  { %p436_p5 = scmp.ne.s32.totalorder %s45_s25, %s435_s11  ;;  %p441_p7 = scmp.lt.s32.totalorder %s435_s11, %s435_s11 }
  0x2e   :  { %p442_p8 = por %p441_p7, %p440_p6 }
  0x30   :  { %p443_p9 = pnand %p442_p8, %p436_p5 }
  0x32   :  { %446 = shalt.err (!%p443_p9)
}
  0x33   :  { %50 = dma.hbm_to_vmem [thread:$0]  %s605_s2, 256, %s45_s25, [#allocation7], %s476_s7, %s476_s7, %s477_s8  }
  0x34   :  { %469 = dma.done.wait [#allocation4], 256  }
  0x35   :  { %470 = vsyncadd [#allocation4], 4294967040 }
  0x36   :  { %471 = dma.done.wait [#allocation7], 512  }
  0x37   :  { %472 = vsyncadd [#allocation7], 4294966784  ;;  %vm85_vm0 = vcmask 261120   ;;  %v482_v0 = vmov 0.0   ;;  %vm483_vm1 = vmmov 0   ;;  %v373_v1 = vld [vmem:[#allocation6] sm:$0xff]   ;;  %v242_v32 = vstv %s608_s5 }
  0x38   :  { %335 = vmatprep.subr.bf16.mxu0 %v482_v0  ;;  %339 = vmatprep.mubr.msk.bf16.mxu0 %vm483_vm1, %v482_v0  ;;  %296 = vst.msk [vmem:[#allocation9] sm:$0xff] %vm85_vm0, %v482_v0  ;;  %297 = vst.msk [vmem:[#allocation9 + $0x8] sm:$0xff] %vm85_vm0, %v482_v0  ;;  %v374_v2 = vld [vmem:[#allocation6 + $0x8] sm:$0xff]   ;;  %v67_v3 = vld [vmem:[#allocation3] sm:$0xff]  ;;  %vm230_vm2 = vcmask 64512   ;;  %vm252_vm3 = vcmask 1043456  }
  0x39   :  { %343 = vmatprep.subr.bf16.mxu1 %v482_v0  ;;  %347 = vmatprep.mubr.msk.bf16.mxu1 %vm483_vm1, %v482_v0  ;;  %v68_v4 = vpack.c.bf16 %v67_v3, %v67_v3  ;;  %v375_v11 = vld [vmem:[#allocation8] sm:$0xff]   ;;  %v376_v12 = vld [vmem:[#allocation8 + $0x8] sm:$0xff]   ;;  %s484_s15 = smov [#allocation9]  }
  0x3a   :  { %336 = vmatpush3.bf16.msra.mxu0 %v373_v1  ;;  %344 = vmatpush3.bf16.msra.mxu1 %v375_v11  ;;  %v186_v13 = vld [vmem:[%s606_s3] sm:$0xff]  ;;  %s304_s16 = sshll.u32 %s484_s15, 4  ;;  %s305_s16 = int_to_ptr.vmem [resolvable:$true] %s304_s16 }
  0x3b   :  { %337 = vmatprep.subr.bf16.mxu0 %v482_v0  ;;  %v87_v5 = vsel %vm85_vm0, %v68_v4, 0  ;;  %345 = vmatprep.subr.bf16.mxu1 %v482_v0  ;;  %v245_v35 = vld [vmem:[%s607_s4] sm:$0xff]  ;;  %s447_s5 = scalar_lea.vmem %s305_s16, 256  ;;  %p452_p11 = scmp.lt.s32.totalorder %s305_s16, %s305_s16 }
  0x3c   :  { %p448_p10 = scmp.ne.s32.totalorder %s305_s16, %s447_s5  ;;  %p453_p12 = scmp.lt.s32.totalorder %s447_s5, %s447_s5 }
  0x3e   :  { %338 = vmatpush3.bf16.msra.mxu0 %v374_v2  ;;  %346 = vmatpush3.bf16.msra.mxu1 %v376_v12  ;;  %p454_p13 = por %p453_p12, %p452_p11 }
  0x3f   :  { %351 = vmatprep.subr.bf16.mxu0 %v482_v0  ;;  %357 = vmatprep.subr.bf16.mxu1 %v482_v0 }
  0x40   :  { %p455_p0 = pnand %p454_p13, %p448_p10 }
  0x41   :  { %340 = vmatmul.mubr.msk.bf16.vlgmr.msra.gmra.mrb[0].mxu0 %vm85_vm0, %v68_v4  ;;  %348 = vmatmul.mubr.msk.bf16.vlgmr.msra.gmra.mrb[0].mxu1 %vm85_vm0, %v68_v4 }
  0x42   :  { %353 = vmatprep.mubr.msk.bf16.mxu0 %vm483_vm1, %v482_v0  ;;  %359 = vmatprep.mubr.msk.bf16.mxu1 %vm483_vm1, %v482_v0 }
  0x47   :  { %352 = vmatpush3.bf16.xpose.msra.mxu0 %v87_v5 }
 0x114   :  { %v123_v6 = vpop.f32.mrb[0].mxu0  ;;  %v180_v25 = vpop.f32.mrb[0].mxu1 }
 0x115   :  { %v129_v7 = vpack.c.bf16 %v123_v6, %v123_v6  ;;  %v341_v8 = vpop.f32.mrb[1].mxu0  ;;  %v349_v26 = vpop.f32.mrb[1].mxu1  ;;  %v248_v29 = vpack.c.bf16 %v180_v25, %v180_v25 }
 0x116   :  { %v126_v9 = vpop.f32.mrb[2].mxu0  ;;  %v183_v27 = vpop.f32.mrb[2].mxu1 }
 0x117   :  { %v342_v10 = vpop.f32.mrb[3].mxu0  ;;  %354 = vmatmul.mubr.msk.bf16.vlgmr.msra.gmra.mrb[4].mxu0 %vm85_vm0, %v129_v7  ;;  %v350_v28 = vpop.f32.mrb[3].mxu1  ;;  %v254_v30 = vsel %vm252_vm3, %v248_v29, 0 }
 0x118   :  { %358 = vmatpush3.bf16.msra.mxu1 %v254_v30 }
 0x1ea   :  { %v224_v14 = vpop.f32.mrb[4].mxu0 }
 0x1eb   :  { %v225_v15 = vadd.f32 %v224_v14, %v186_v13  ;;  %v355_v16 = vpop.f32.mrb[5].mxu0 }
 0x1ec   :  { %v227_v17 = vpop.f32.mrb[6].mxu0 }
 0x1ed   :  { %v356_v18 = vpop.f32.mrb[7].mxu0  ;;  %v231_v19 = vsel %vm230_vm2, %v225_v15, -inf }
 0x1ee   :  { %232 = vmax.xlane.f32.xlu0 %v231_v19 }
 0x27b   :  { %v233_v20 = vpop.xlane.xlu0 %232 }
 0x27c   :  { %v234_v21 = vsub.f32 %v225_v15, %v233_v20 }
 0x27e   :  { %v235_v22 = vmul.f32 1.442695, %v234_v21 }
 0x280   :  { %377 = vpow2.f32 %v235_v22 }
 0x28a   :  { %v378_v23 = vpop.eup %377 }
 0x28b   :  { %v237_v24 = vsel %vm230_vm2, %v378_v23, 0.0 }
 0x28c   :  { %238 = vadd.xlane.f32.xlu0 %v237_v24 }
 0x319   :  { %v239_v31 = vpop.xlane.xlu0 %238 }
 0x31a   :  { %379 = vrcp.f32 %v239_v31 }
 0x324   :  { %v380_v33 = vpop.eup %379 }
 0x325   :  { %v243_v34 = vmul.f32 %v380_v33, %v242_v32 }
 0x327   :  { %v244_v36 = vmul.f32 %v378_v23, %v243_v34 }
 0x329   :  { %v246_v37 = vadd.f32 %v245_v35, %v244_v36 }
 0x32b   :  { %v247_v38 = vpack.c.bf16 %v246_v37, %v246_v37 }
 0x32d   :  { %360 = vmatmul.mubr.msk.bf16.vlgmr.msra.gmra.mrb[4].mxu1 %vm230_vm2, %v247_v38 }
 0x400   :  { %v290_v39 = vpop.f32.mrb[4].mxu1 }
 0x401   :  { %298 = vst.msk [vmem:[#allocation9] sm:$0xff] %vm85_vm0, %v290_v39  ;;  %v361_v40 = vpop.f32.mrb[5].mxu1 }
 0x402   :  { %v293_v41 = vpop.f32.mrb[6].mxu1 }
 0x403   :  { %458 = shalt.err (!%p455_p0)
}
 0x404   :  { %s459_s18 = scalar_lea.hbm %s609_s6, 256 }
 0x405   :  { %p460_p1 = scmp.ne.s32.totalorder %s609_s6, %s459_s18  ;;  %p463_p2 = scmp.lt.u32.totalorder %s459_s18, %s609_s6 }
 0x407   :  { %p465_p3 = pnand %p463_p2, %p460_p1 }
 0x409   :  { %468 = shalt.err (!%p465_p3)
}
 0x40a   :  { %310 = dma.vmem_to_hbm [thread:$0]  %s305_s16, 256, %s609_s6, [#allocation5], %s479_s1, %s479_s1, %s480_s21   ;;  %v362_v42 = vpop.f32.mrb[7].mxu1 }
 0x40b   :  { %473 = dma.done.wait [#allocation5], 256  }
 0x40c   :  { %474 = vsyncadd [#allocation5], 4294967040 }
 0x40d   :  { %314 = vsyncpa [#allocation4], 1 }
 0x40e   :  { %315 = vsyncpa [#allocation7], 1 }
 0x40f   :  { %316 = vsyncpa [#allocation5], 1 }

</bundles_post_ra>
